<compile_context>
chip_gen: v6e
topology: v6e:2x2x1
jax: 0.10.0
libtpu: 0.0.40
codegen_flags: <defaults>
</compile_context>

<pallas_src>
import jax
import jax.numpy as jnp
from jax.experimental import pallas as pl
from jax.experimental.pallas import tpu as pltpu


K_AUG = 16  # augmented/padded contraction length: 8 features + 1 bias + 7 pad
N_OUT = 16  # fused output width: 8 (linear1) + 8 (linear2)


def _fused_two_linear_kernel(x_ref, w_ref, o_ref):
    # x_ref: (16, 1)  augmented input column [x; 1; zeros(7)]
    # w_ref: (16, 16) augmented fused weights [[W1.T | W2.T], [b1 | b2], zeros]
    # o_ref: (1, 16)  fused output [o1 | o2]
    #
    # VPU/XLU formulation: lane-broadcast the input column, elementwise multiply,
    # sublane-reduce. Avoids the MXU push + result-FIFO pop for a 1-row matmul.
    o_ref[...] = jnp.sum(x_ref[...] * w_ref[...], axis=0, keepdims=True)


def fuse_two_linear_params(w1, b1, w2, b2):
    """One-time parameter preparation (NOT on the per-call path).

    w1/w2: (8, 8) PyTorch (out, in) layout; b1/b2: (8,).
    Returns W_aug of shape (16, 16): rows 0..7 = [W1.T | W2.T], row 8 = [b1 | b2],
    rows 9..15 = zeros (sublane padding so the in-kernel reduce is over a full,
    cleanly-shaped tile).
    """
    w_fused = jnp.concatenate([w1.T, w2.T], axis=1).astype(jnp.float32)      # (8, 16)
    b_fused = jnp.concatenate([b1, b2], axis=0).reshape(1, N_OUT).astype(jnp.float32)
    pad = jnp.zeros((K_AUG - 9, N_OUT), dtype=jnp.float32)                   # (7, 16)
    return jnp.concatenate([w_fused, b_fused, pad], axis=0)                  # (16, 16)


@jax.jit
def module_return_two(x, w_aug):
    """x: (8,) f32; w_aug: (16, 16) pre-fused augmented parameters.

    Returns (o1, o2), each (8,), matching o_i = x @ w_i.T + b_i.
    """
    # Per-call plumbing is only the augmented input column [x; 1; 0...] — tiny.
    x_aug = jnp.zeros((K_AUG, 1), dtype=jnp.float32)
    x_aug = x_aug.at[:8, 0].set(x.astype(jnp.float32))
    x_aug = x_aug.at[8, 0].set(1.0)

    out = pl.pallas_call(
        _fused_two_linear_kernel,
        out_shape=jax.ShapeDtypeStruct((1, N_OUT), jnp.float32),
        in_specs=[
            pl.BlockSpec(memory_space=pltpu.VMEM),   # x_aug (16, 1)
            pl.BlockSpec(memory_space=pltpu.VMEM),   # w_aug (16, 16)
        ],
        out_specs=pl.BlockSpec(memory_space=pltpu.VMEM),
    )(x_aug, w_aug)

    o1 = out[0, :8]
    o2 = out[0, 8:]
    return o1, o2


if __name__ == "__main__":
    key = jax.random.PRNGKey(0)
    kx, k1w, k1b, k2w, k2b = jax.random.split(key, 5)

    # Deterministic synthetic parameters (same shapes as nn.Linear(8, 8)).
    x = jax.random.normal(kx, (8,), dtype=jnp.float32)
    w1 = jax.random.normal(k1w, (8, 8), dtype=jnp.float32) * 0.1
    b1 = jax.random.normal(k1b, (8,), dtype=jnp.float32) * 0.1
    w2 = jax.random.normal(k2w, (8, 8), dtype=jnp.float32) * 0.1
    b2 = jax.random.normal(k2b, (8,), dtype=jnp.float32) * 0.1

    # One-time fusion (hoisted off the per-call path).
    w_aug = jax.block_until_ready(fuse_two_linear_params(w1, b1, w2, b2))

    o1, o2 = module_return_two(x, w_aug)
    jax.block_until_ready((o1, o2))

    # Reference check in plain JAX (PyTorch Linear semantics).
    ref1 = x @ w1.T + b1
    ref2 = x @ w2.T + b2
    assert jnp.allclose(o1, ref1, atol=1e-5), "o1 mismatch"
    assert jnp.allclose(o2, ref2, atol=1e-5), "o2 mismatch"

    print("KERNEL_OK")
</pallas_src>

<mosaic_0001>
module attributes {stable_mosaic.version = 11 : i64} {
  func.func @_fused_two_linear_kernel(%arg0: memref<16x1xf32, #tpu.memory_space<vmem>>, %arg1: memref<16x16xf32, #tpu.memory_space<vmem>>, %arg2: memref<1x16xf32, #tpu.memory_space<vmem>>) attributes {dimension_semantics = [], scalar_prefetch = 0 : i64, scratch_operands = 0 : i64, tpu.core_type = #tpu.core_type<tc>} {
    %c0 = arith.constant 0 : index
    %c0_0 = arith.constant 0 : index
    %0 = vector.load %arg0[%c0, %c0_0] : memref<16x1xf32, #tpu.memory_space<vmem>>, vector<16x1xf32>
    %c0_1 = arith.constant 0 : index
    %c0_2 = arith.constant 0 : index
    %1 = vector.load %arg1[%c0_1, %c0_2] : memref<16x16xf32, #tpu.memory_space<vmem>>, vector<16x16xf32>
    %2 = vector.broadcast %0 : vector<16x1xf32> to vector<16x16xf32>
    %3 = arith.mulf %2, %1 : vector<16x16xf32>
    %cst = arith.constant dense<0.000000e+00> : vector<16xf32>
    %4 = vector.multi_reduction <add>, %3, %cst [0] : vector<16x16xf32> to vector<16xf32>
    %5 = vector.shape_cast %4 : vector<16xf32> to vector<1x16xf32>
    %c0_3 = arith.constant 0 : index
    %c0_4 = arith.constant 0 : index
    %6 = vector.load %arg2[%c0_3, %c0_4] : memref<1x16xf32, #tpu.memory_space<vmem>>, vector<1x16xf32>
    tpu.vector_store %arg2[%c0_3, %c0_4], %5 {strides = array<i32>} : memref<1x16xf32, #tpu.memory_space<vmem>>, vector<1x16xf32>,
    return
  }
}

</mosaic_0001>

<bundles_post_ra>
// kernel: module_return_two.1
= control target key start
LH: loop header
LB: loop body
LE: loop exit
PB: predicated region body
PF: predicated region fallthrough
CT: control target
= control target key end

     0   :  { %v45_v0 = vmov 0   ;;  %vm27_vm0 = vcmask 130048   ;;  %vm37_vm1 = vcmask 122880   ;;  %s76_s0 = inlined_call_operand.vmem [shape: f32[16,1], index: 0, kind: input, shape index: {}]   ;;  %s77_s1 = inlined_call_operand.vmem [shape: f32[16,16], index: 1, kind: input, shape index: {}]   ;;  %s78_s2 = inlined_call_operand.vmem [shape: f32[1,16], index: 2, kind: output, shape index: {}]  }
   0x1   :  { %44 = vset.pattern.permute.xlu0 %v45_v0  ;;  %v11_v1 = vld [vmem:[%s76_s0] sm:$0xff]  ;;  %v12_v2 = vld [vmem:[%s76_s0 + $0x8] sm:$0xff] }
   0x2   :  { %17 = vperm.xlu0 %44, %v11_v1   ;;  %v13_v3 = vld [vmem:[%s77_s1] sm:$0xff]  ;;  %v14_v5 = vld [vmem:[%s77_s1 + $0x8] sm:$0xff] }
   0x6   :  { %22 = vperm.xlu0 %44, %v12_v2  }
  0x7d   :  { %v18_v4 = vpop.permute.xlu0 %17 }
  0x7e   :  { %v25_v6 = vmul.f32 %v18_v4, %v13_v3 }
  0x80   :  { %v28_v9 = vsel %vm27_vm0, %v25_v6, 0.0 }
  0x81   :  { %v23_v7 = vpop.permute.xlu0 %22 }
  0x82   :  { %v26_v8 = vmul.f32 %v23_v7, %v14_v5 }
  0x84   :  { %v29_v10 = vsel %vm27_vm0, %v26_v8, 0.0 }
  0x85   :  { %v30_v11 = vadd.f32 %v29_v10, %v28_v9 }
  0x87   :  { %v31_v12 = vrot.slane %v30_v11, 4 }
  0x89   :  { %v32_v13 = vadd.f32 %v31_v12, %v30_v11 }
  0x8b   :  { %v33_v14 = vrot.slane %v32_v13, 2 }
  0x8d   :  { %v34_v15 = vadd.f32 %v33_v14, %v32_v13 }
  0x8f   :  { %v35_v16 = vrot.slane %v34_v15, 1 }
  0x91   :  { %v36_v17 = vadd.f32 %v35_v16, %v34_v15 }
  0x93   :  { %38 = vst.msk [vmem:[%s78_s2] sm:$0x1] %vm37_vm1, %v36_v17 }

</bundles_post_ra>
